<compile_context>
chip_gen: v5e
topology: v5e:2x2
jax: 0.10.0
libtpu: 0.0.40
codegen_flags: <defaults>
</compile_context>

<pallas_src>
import jax
import jax.numpy as jnp
from jax.experimental import pallas as pl
from jax.experimental.pallas import tpu as pltpu

BN_EPS = 1e-5
_LANES = 128
_VMEM_LIMIT = 32 * 1024 * 1024  # safe on v5e/v6e (128 MiB) and v7x (64 MiB)


# --------------------------------------------------------------------------
# in-kernel helpers (all shapes static at trace time)
# --------------------------------------------------------------------------
def _conv1x1_rows(w_ref, k, xc):
    """Weighted sum over input channels for output channel k.
    xc: list of (S, 128) f32 arrays. Two independent partial chains for ILP."""
    cin = len(xc)
    p0 = w_ref[k, 0] * xc[0]
    p1 = None
    for c in range(1, cin):
        term = w_ref[k, c] * xc[c]
        if c % 2 == 1:
            p1 = term if p1 is None else p1 + term
        else:
            p0 = p0 + term
    return p0 if p1 is None else p0 + p1


def _rows_group_sum(v, s):
    """Sum an (s, 128) f32 array over 8-row groups -> (8, 128).  s % 8 == 0.
    Static aligned slices + log-depth tree of vreg adds (no layout changes)."""
    parts = [v[r0:r0 + 8] for r0 in range(0, s, 8)]
    while len(parts) > 1:
        nxt = []
        for i in range(0, len(parts) - 1, 2):
            nxt.append(parts[i] + parts[i + 1])
        if len(parts) % 2:
            nxt.append(parts[-1])
        parts = nxt
    return parts[0]


# --------------------------------------------------------------------------
# kernels
# --------------------------------------------------------------------------
def _identity_double_kernel(x_ref, o_ref):
    # shortcut == Identity and blocks == Identity  =>  out = x + x = 2*x
    o_ref[...] = x_ref[...] * 2


def _shortcut_stats_kernel(x_ref, w_ref, acc_ref):
    """Accumulate per-(batch, out-channel) partial sum / sum-of-squares of the
    1x1-conv output across all pixel tiles of the current batch element."""
    out_ch, cin = w_ref.shape                 # static (SMEM ref)
    s = x_ref.shape[2]                        # rows in this block (static)
    acc_rows = acc_ref.shape[2]               # 8 (group-reduced) or s

    @pl.when(pl.program_id(1) == 0)
    def _init():
        acc_ref[...] = jnp.zeros_like(acc_ref)

    xc = [x_ref[0, c].astype(jnp.float32) for c in range(cin)]   # each (S, 128)
    for k in range(out_ch):
        conv = _conv1x1_rows(w_ref, k, xc)                        # (S, 128) f32
        sq = conv * conv
        if acc_rows == 8 and s % 8 == 0:
            conv = _rows_group_sum(conv, s)                       # (8, 128)
            sq = _rows_group_sum(sq, s)
        acc_ref[0, k] += conv
        acc_ref[0, out_ch + k] += sq


def _shortcut_normadd_kernel(x_ref, w_ref, scale_ref, shift_ref, o_ref):
    """out = x + BN(conv1x1(x)); out_ch == 1 so the single residual channel
    broadcasts across all input channels (the only torch-broadcast-valid case)."""
    out_ch, cin = w_ref.shape                 # static (SMEM ref)
    del out_ch                                # == 1 (asserted in the wrapper)
    xc = [x_ref[0, c].astype(jnp.float32) for c in range(cin)]   # each (S, 128)
    conv = _conv1x1_rows(w_ref, 0, xc)                            # (S, 128) f32
    res = conv * scale_ref[0] + shift_ref[0]                      # BN as scale/shift
    for c in range(cin):
        o_ref[0, c] = (xc[c] + res).astype(o_ref.dtype)           # broadcast add


# --------------------------------------------------------------------------
# host-side tiling helpers
# --------------------------------------------------------------------------
def _padded_extent(n):
    """Pad a streamed extent so it maps onto full (8-sublane, 128-lane) tiles."""
    n_pad = ((n + _LANES - 1) // _LANES) * _LANES
    rows = n_pad // _LANES
    if rows > 8 and rows % 8 != 0:
        rows = ((rows + 7) // 8) * 8
    return rows * _LANES


def _pick_row_tile(rows, row_bytes, target_bytes):
    """Rows per block: a multiple of 8 dividing `rows` that streams roughly
    target_bytes of input per block, or the full extent."""
    target_rows = max(8, target_bytes // max(row_bytes, 1))
    if rows <= target_rows:
        return rows                      # single full-extent block along this axis
    s = (target_rows // 8) * 8
    while s >= 8:
        if rows % s == 0:
            return s
        s -= 8
    return rows                          # unreachable after _padded_extent


# --------------------------------------------------------------------------
# wrapper
# --------------------------------------------------------------------------
def resnet_block_forward(x_nchw, params=None, *, inplanes, planes, expansion=1,
                         downsampling=1, block_bytes=4 * 1024 * 1024):
    N, C, H, W = x_nchw.shape
    assert C == inplanes
    out_ch = expansion * planes
    dtype = x_nchw.dtype
    elem = x_nchw.dtype.itemsize
    HW = H * W

    def cparams(sems):
        return pltpu.CompilerParams(dimension_semantics=sems,
                                    vmem_limit_bytes=_VMEM_LIMIT)

    # ---------------- identity shortcut: out = 2 * x (pure HBM stream) --------
    if inplanes == out_ch:
        total = N * C * HW
        tot_pad = _padded_extent(total)
        flat = x_nchw.reshape(total)
        if tot_pad != total:
            flat = jnp.pad(flat, (0, tot_pad - total))
        rows = tot_pad // _LANES
        x2 = flat.reshape(rows, _LANES)
        S = _pick_row_tile(rows, _LANES * elem, block_bytes)
        out2 = pl.pallas_call(
            _identity_double_kernel,
            out_shape=jax.ShapeDtypeStruct((rows, _LANES), dtype),
            grid=(rows // S,),
            in_specs=[pl.BlockSpec((S, _LANES), lambda i: (i, 0))],
            out_specs=pl.BlockSpec((S, _LANES), lambda i: (i, 0)),
            input_output_aliases={0: 0},      # torch's in-place `x += residual`
            compiler_params=cparams(("parallel",)),
        )(x2)
        out_flat = out2.reshape(tot_pad)
        if tot_pad != total:
            out_flat = out_flat[:total]
        return out_flat.reshape(N, C, H, W)

    # -------- conv_bn shortcut: Conv2dAuto(k=1, stride=downsampling, bias=False)
    #          + BatchNorm2d(out_ch) in training mode.
    # torch's in-place `x += residual` only broadcasts when out_ch == 1 and the
    # spatial shapes match (downsampling == 1); same constraint as the module.
    assert downsampling == 1 and out_ch == 1, (
        "x += residual must be broadcast-compatible (same as the torch module)")

    w2d = params["conv_w"].reshape(out_ch, inplanes).astype(jnp.float32)
    gamma = params["bn_gamma"].reshape(out_ch).astype(jnp.float32)
    beta = params["bn_beta"].reshape(out_ch).astype(jnp.float32)

    hw_pad = _padded_extent(HW)
    x3 = x_nchw.reshape(N, C, HW)
    if hw_pad != HW:
        # zero padding is exact for BN batch stats: conv(0) = 0 contributes
        # nothing to the sums; the true pixel count is used below.
        x3 = jnp.pad(x3, ((0, 0), (0, 0), (0, hw_pad - HW)))
    rows = hw_pad // _LANES
    x4 = x3.reshape(N, C, rows, _LANES)                 # lane-dense NCHW layout

    S = _pick_row_tile(rows, C * _LANES * elem, block_bytes)
    acc_rows = 8 if S % 8 == 0 else S                   # full-vreg accumulator
    grid = (N, rows // S)
    blk = pl.BlockSpec((1, C, S, _LANES), lambda n, t: (n, 0, t, 0))
    smem = pl.BlockSpec(memory_space=pltpu.MemorySpace.SMEM)

    # ---- pass 1: per-batch partial BN batch statistics -----------------------
    # Output block indexed by n => batch axis is "parallel" (both v7x cores run),
    # pixel-tile axis is "arbitrary" (resident accumulator, init at t == 0).
    partial = pl.pallas_call(
        _shortcut_stats_kernel,
        out_shape=jax.ShapeDtypeStruct((N, 2 * out_ch, acc_rows, _LANES),
                                       jnp.float32),
        grid=grid,
        in_specs=[blk, smem],
        out_specs=pl.BlockSpec((1, 2 * out_ch, acc_rows, _LANES),
                               lambda n, t: (n, 0, 0, 0)),
        compiler_params=cparams(("parallel", "arbitrary")),
    )(x4, w2d)

    count = jnp.float32(N * HW)                          # true (unpadded) count
    sums = jnp.sum(partial[:, :out_ch], axis=(0, 2, 3))  # [out_ch]
    sumsq = jnp.sum(partial[:, out_ch:], axis=(0, 2, 3))
    mean = sums / count
    # one-pass variance in f32; clamp tiny negatives from cancellation
    var = jnp.maximum(sumsq / count - mean * mean, 0.0)
    scale = gamma * jax.lax.rsqrt(var + BN_EPS)
    shift = beta - mean * scale

    # ---- pass 2: normalize + broadcast residual add (fully parallel, in place)
    out4 = pl.pallas_call(
        _shortcut_normadd_kernel,
        out_shape=jax.ShapeDtypeStruct((N, C, rows, _LANES), dtype),
        grid=grid,
        in_specs=[blk, smem, smem, smem],
        out_specs=blk,
        input_output_aliases={0: 0},          # torch's in-place `x += residual`
        compiler_params=cparams(("parallel", "parallel")),
    )(x4, w2d, scale, shift)

    out3 = out4.reshape(N, C, hw_pad)
    if hw_pad != HW:
        out3 = out3[:, :, :HW]
    return out3.reshape(N, C, H, W)


# --------------------------------------------------------------------------
# demo / self-check
# --------------------------------------------------------------------------
if __name__ == "__main__":
    key = jax.random.PRNGKey(0)
    k_x, k_w, k_x2 = jax.random.split(key, 3)

    # conv_bn shortcut path runs when inplanes != expansion*planes; out_ch == 1
    # keeps torch's in-place add broadcast-valid.
    N, Cin, H, W = 2, 4, 16, 16
    inplanes, planes, expansion, downsampling = 4, 1, 1, 1
    out_ch = expansion * planes

    x = jax.random.normal(k_x, (N, Cin, H, W), dtype=jnp.float32)
    params = {
        # Conv2d weight shape [out_ch, in_ch, 1, 1]
        "conv_w": 0.1 * jax.random.normal(k_w, (out_ch, inplanes, 1, 1),
                                          jnp.float32),
        # torch BatchNorm2d default init: weight=1, bias=0
        "bn_gamma": jnp.ones((out_ch,), jnp.float32),
        "bn_beta": jnp.zeros((out_ch,), jnp.float32),
    }
    # TODO(synk): BatchNorm running-stat buffer updates (training-mode side
    # effect) are not replicated; they do not affect the forward output.

    def ref_conv_bn(xv):
        conv = jnp.einsum("nchw,kc->nkhw", xv.astype(jnp.float32),
                          params["conv_w"].reshape(out_ch, inplanes))
        mean = jnp.mean(conv, axis=(0, 2, 3), keepdims=True)
        var = jnp.mean((conv - mean) ** 2, axis=(0, 2, 3), keepdims=True)
        residual = ((conv - mean) * jax.lax.rsqrt(var + BN_EPS)
                    * params["bn_gamma"].reshape(1, out_ch, 1, 1)
                    + params["bn_beta"].reshape(1, out_ch, 1, 1))
        return xv.astype(jnp.float32) + residual

    # --- conv_bn shortcut path at the small reference shape -------------------
    out = jax.block_until_ready(
        resnet_block_forward(x, params, inplanes=inplanes, planes=planes,
                             expansion=expansion, downsampling=downsampling))
    assert out.shape == (N, Cin, H, W)
    assert jnp.allclose(out, ref_conv_bn(x), atol=1e-4, rtol=1e-4), \
        "conv_bn shortcut mismatch"

    # --- larger shape + small block budget: exercises multi-tile accumulation,
    #     the in-kernel 8-row group reduction, and per-batch partial stats ------
    x_big = jax.random.normal(k_x2, (2, 4, 64, 64), dtype=jnp.float32)
    out_big = jax.block_until_ready(
        resnet_block_forward(x_big, params, inplanes=4, planes=1,
                             block_bytes=32 * 1024))   # S=16 -> 2 pixel tiles/batch
    assert jnp.allclose(out_big, ref_conv_bn(x_big), atol=1e-4, rtol=1e-4), \
        "multi-tile conv_bn mismatch"

    # --- identity shortcut path (inplanes == expansion * planes) ---------------
    out_id = jax.block_until_ready(
        resnet_block_forward(x, params, inplanes=4, planes=4))
    assert jnp.allclose(out_id, 2.0 * x, atol=1e-6), "identity shortcut mismatch"

    # --- identity path in bf16: native-dtype streaming (no wrapper f32 cast) ---
    x_bf = x.astype(jnp.bfloat16)
    out_bf = jax.block_until_ready(
        resnet_block_forward(x_bf, params, inplanes=4, planes=4))
    assert out_bf.dtype == jnp.bfloat16
    assert jnp.allclose(out_bf.astype(jnp.float32),
                        2.0 * x_bf.astype(jnp.float32), atol=1e-2), \
        "bf16 identity shortcut mismatch"

    print("KERNEL_OK")
</pallas_src>

<mosaic_0001>
module attributes {stable_mosaic.version = 11 : i64} {
  func.func @_shortcut_stats_kernel(%arg0: i32, %arg1: i32, %arg2: memref<1x4x2x128xf32, #tpu.memory_space<vmem>>, %arg3: memref<1x4xf32, #tpu.memory_space<smem>>, %arg4: memref<1x2x2x128xf32, #tpu.memory_space<vmem>>) attributes {dimension_semantics = [#tpu.dimension_semantics<parallel>, #tpu.dimension_semantics<arbitrary>], iteration_bounds = array<i64: 2, 1>, scalar_prefetch = 0 : i64, scratch_operands = 0 : i64, tpu.core_type = #tpu.core_type<tc>, window_params = [{transform_indices = @transform_0, window_bounds = array<i64: 1, 4, 2, 128>}, {transform_indices = @transform_1, window_bounds = array<i64: 1, 4>}, {transform_indices = @transform_2, window_bounds = array<i64: 1, 2, 2, 128>}]} {
    %c0_i32 = arith.constant 0 : i32
    %0 = arith.cmpi eq, %arg1, %c0_i32 : i32
    %1 = arith.extui %0 : i1 to i32
    %c0_i32_0 = arith.constant 0 : i32
    %2 = arith.cmpi ne, %1, %c0_i32_0 : i32
    scf.if %2 {
      %cst = arith.constant 0.000000e+00 : f32
      %39 = vector.broadcast %cst : f32 to vector<1x2x2x128xf32>
      %c0_37 = arith.constant 0 : index
      %c0_38 = arith.constant 0 : index
      %c0_39 = arith.constant 0 : index
      %c0_40 = arith.constant 0 : index
      %40 = vector.load %arg4[%c0_37, %c0_38, %c0_39, %c0_40] : memref<1x2x2x128xf32, #tpu.memory_space<vmem>>, vector<1x2x2x128xf32>
      tpu.vector_store %arg4[%c0_37, %c0_38, %c0_39, %c0_40], %39 {strides = array<i32>} : memref<1x2x2x128xf32, #tpu.memory_space<vmem>>, vector<1x2x2x128xf32>,
    } else {
    }
    %c0 = arith.constant 0 : index
    %c0_1 = arith.constant 0 : index
    %c0_2 = arith.constant 0 : index
    %c0_3 = arith.constant 0 : index
    %3 = vector.load %arg2[%c0, %c0_1, %c0_2, %c0_3] : memref<1x4x2x128xf32, #tpu.memory_space<vmem>>, vector<1x1x2x128xf32>
    %4 = vector.shape_cast %3 : vector<1x1x2x128xf32> to vector<2x128xf32>
    %c0_4 = arith.constant 0 : index
    %c1 = arith.constant 1 : index
    %c0_5 = arith.constant 0 : index
    %c0_6 = arith.constant 0 : index
    %5 = vector.load %arg2[%c0_4, %c1, %c0_5, %c0_6] : memref<1x4x2x128xf32, #tpu.memory_space<vmem>>, vector<1x1x2x128xf32>
    %6 = vector.shape_cast %5 : vector<1x1x2x128xf32> to vector<2x128xf32>
    %c0_7 = arith.constant 0 : index
    %c2 = arith.constant 2 : index
    %c0_8 = arith.constant 0 : index
    %c0_9 = arith.constant 0 : index
    %7 = vector.load %arg2[%c0_7, %c2, %c0_8, %c0_9] : memref<1x4x2x128xf32, #tpu.memory_space<vmem>>, vector<1x1x2x128xf32>
    %8 = vector.shape_cast %7 : vector<1x1x2x128xf32> to vector<2x128xf32>
    %c0_10 = arith.constant 0 : index
    %c3 = arith.constant 3 : index
    %c0_11 = arith.constant 0 : index
    %c0_12 = arith.constant 0 : index
    %9 = vector.load %arg2[%c0_10, %c3, %c0_11, %c0_12] : memref<1x4x2x128xf32, #tpu.memory_space<vmem>>, vector<1x1x2x128xf32>
    %10 = vector.shape_cast %9 : vector<1x1x2x128xf32> to vector<2x128xf32>
    %c0_13 = arith.constant 0 : index
    %c0_14 = arith.constant 0 : index
    %11 = memref.load %arg3[%c0_13, %c0_14] : memref<1x4xf32, #tpu.memory_space<smem>>
    %12 = vector.broadcast %11 : f32 to vector<2x128xf32>
    %13 = arith.mulf %12, %4 : vector<2x128xf32>
    %c0_15 = arith.constant 0 : index
    %c1_16 = arith.constant 1 : index
    %14 = memref.load %arg3[%c0_15, %c1_16] : memref<1x4xf32, #tpu.memory_space<smem>>
    %15 = vector.broadcast %14 : f32 to vector<2x128xf32>
    %16 = arith.mulf %15, %6 : vector<2x128xf32>
    %c0_17 = arith.constant 0 : index
    %c2_18 = arith.constant 2 : index
    %17 = memref.load %arg3[%c0_17, %c2_18] : memref<1x4xf32, #tpu.memory_space<smem>>
    %18 = vector.broadcast %17 : f32 to vector<2x128xf32>
    %19 = arith.mulf %18, %8 : vector<2x128xf32>
    %20 = arith.addf %13, %19 : vector<2x128xf32>
    %c0_19 = arith.constant 0 : index
    %c3_20 = arith.constant 3 : index
    %21 = memref.load %arg3[%c0_19, %c3_20] : memref<1x4xf32, #tpu.memory_space<smem>>
    %22 = vector.broadcast %21 : f32 to vector<2x128xf32>
    %23 = arith.mulf %22, %10 : vector<2x128xf32>
    %24 = arith.addf %16, %23 : vector<2x128xf32>
    %25 = arith.addf %20, %24 : vector<2x128xf32>
    %26 = arith.mulf %25, %25 : vector<2x128xf32>
    %c0_21 = arith.constant 0 : index
    %c0_22 = arith.constant 0 : index
    %c0_23 = arith.constant 0 : index
    %c0_24 = arith.constant 0 : index
    %27 = vector.load %arg4[%c0_21, %c0_22, %c0_23, %c0_24] : memref<1x2x2x128xf32, #tpu.memory_space<vmem>>, vector<1x1x2x128xf32>
    %28 = vector.shape_cast %27 : vector<1x1x2x128xf32> to vector<2x128xf32>
    %29 = arith.addf %28, %25 : vector<2x128xf32>
    %c0_25 = arith.constant 0 : index
    %c0_26 = arith.constant 0 : index
    %c0_27 = arith.constant 0 : index
    %c0_28 = arith.constant 0 : index
    %30 = vector.load %arg4[%c0_25, %c0_26, %c0_27, %c0_28] : memref<1x2x2x128xf32, #tpu.memory_space<vmem>>, vector<1x1x2x128xf32>
    %31 = vector.shape_cast %30 : vector<1x1x2x128xf32> to vector<2x128xf32>
    %32 = vector.shape_cast %29 : vector<2x128xf32> to vector<1x1x2x128xf32>
    tpu.vector_store %arg4[%c0_25, %c0_26, %c0_27, %c0_28], %32 {strides = array<i32>} : memref<1x2x2x128xf32, #tpu.memory_space<vmem>>, vector<1x1x2x128xf32>,
    %c0_29 = arith.constant 0 : index
    %c1_30 = arith.constant 1 : index
    %c0_31 = arith.constant 0 : index
    %c0_32 = arith.constant 0 : index
    %33 = vector.load %arg4[%c0_29, %c1_30, %c0_31, %c0_32] : memref<1x2x2x128xf32, #tpu.memory_space<vmem>>, vector<1x1x2x128xf32>
    %34 = vector.shape_cast %33 : vector<1x1x2x128xf32> to vector<2x128xf32>
    %35 = arith.addf %34, %26 : vector<2x128xf32>
    %c0_33 = arith.constant 0 : index
    %c1_34 = arith.constant 1 : index
    %c0_35 = arith.constant 0 : index
    %c0_36 = arith.constant 0 : index
    %36 = vector.load %arg4[%c0_33, %c1_34, %c0_35, %c0_36] : memref<1x2x2x128xf32, #tpu.memory_space<vmem>>, vector<1x1x2x128xf32>
    %37 = vector.shape_cast %36 : vector<1x1x2x128xf32> to vector<2x128xf32>
    %38 = vector.shape_cast %35 : vector<2x128xf32> to vector<1x1x2x128xf32>
    tpu.vector_store %arg4[%c0_33, %c1_34, %c0_35, %c0_36], %38 {strides = array<i32>} : memref<1x2x2x128xf32, #tpu.memory_space<vmem>>, vector<1x1x2x128xf32>,
    return
  }
  func.func @transform_0(%arg0: i32, %arg1: i32) -> (i32, i32, i32, i32) {
    %c0_i32 = arith.constant 0 : i32
    %c0_i32_0 = arith.constant 0 : i32
    %c0_i32_1 = arith.constant 0 : i32
    return %arg0, %c0_i32, %arg1, %c0_i32_0 : i32, i32, i32, i32
  }
  func.func @transform_1(%arg0: i32, %arg1: i32) -> (i32, i32) {
    %c0_i32 = arith.constant 0 : i32
    %c0_i32_0 = arith.constant 0 : i32
    %c0_i32_1 = arith.constant 0 : i32
    return %c0_i32, %c0_i32_0 : i32, i32
  }
  func.func @transform_2(%arg0: i32, %arg1: i32) -> (i32, i32, i32, i32) {
    %c0_i32 = arith.constant 0 : i32
    %c0_i32_0 = arith.constant 0 : i32
    %c0_i32_1 = arith.constant 0 : i32
    %c0_i32_2 = arith.constant 0 : i32
    return %arg0, %c0_i32, %c0_i32_0, %c0_i32_1 : i32, i32, i32, i32
  }
}

</mosaic_0001>

<bundles_post_ra>
// kernel: tpu_custom_call.1
= control target key start
LH: loop header
LB: loop body
LE: loop exit
PB: predicated region body
PF: predicated region fallthrough
CT: control target
= control target key end

     0   :  { %7 = vsyncpa [#allocation3], 0  ;;  %s760_s0 = inlined_call_operand.hbm [shape: f32[2,4,2,128], index: 0, kind: input, shape index: {}]   ;;  %s761_s1 = inlined_call_operand.hbm [shape: f32[1,4], index: 1, kind: input, shape index: {}]   ;;  %s762_s2 = inlined_call_operand.hbm [shape: f32[2,2,2,128], index: 2, kind: output, shape index: {}]  }
   0x1   :  { %9 = vsyncpa [#allocation3 + $0x1], 0 }
   0x2   :  { %10 = vsyncpa [#allocation5], 0 }
   0x3   :  { %11 = vsyncpa [#allocation4], 0 }
   0x4   :  { %13 = vsyncpa [#allocation4 + $0x1], 0  ;;  %s599_s9 = smov 0   ;;  %s601_s10 = smov 0  }
   0x5   :  { %s603_s11 = smov 0   ;;  %s605_s12 = smov 0  }
   0x6   :  { %s607_s13 = smov 0   ;;  %s609_s14 = smov 0  }
   0x7 LB: > { %s340_s15 = sadd.s32 4294967295, %s576_s14   ;;  %s341_s16 = sadd.s32 4294967294, %s576_s14   ;;  %s576_s14 = sphi %s609_s14, %s19_s14   ;;  %s572_s13 = sphi %s607_s13, %s774_s13   ;;  %s568_s12 = sphi %s605_s12, %s773_s12   ;;  %s564_s11 = sphi %s603_s11, %s772_s11   ;;  %s560_s10 = sphi %s601_s10, %s771_s10   ;;  %s556_s9 = sphi %s599_s9, %s770_s9  }
   0x8   : > { %s40_s17 = sadd.s32 1, %s564_s11  ;;  %p47_p0 = scmp.ne.s32.totalorder %s564_s11, %s560_s10 }
   0x9   : > { %p48_p1 = scmp.eq.s32.totalorder %s576_s14, 0  ;;  %p53_p2 = scmp.ne.s32.totalorder %s560_s10, %s556_s9 }
   0xa   : > { %p637_p3 = scmp.eq.s32.totalorder %s340_s15, 0  ;;  %p98_p4 = scmp.eq.s32.totalorder %s340_s15, 1 }
   0xb   : > { %p641_p5 = por %p48_p1, %p47_p0  ;;  %p104_p6 = scmp.eq.s32.totalorder %s341_s16, 1 }
   0xc   : > { %p647_p7 = por %p637_p3, %p53_p2  ;;  %p651_p8 = por %p98_p4, %p47_p0 }
   0xd   : > { %p655_p9 = por %p104_p6, %p53_p2  ;;  %p342_p10 = scmp.ge.s32.totalorder %s576_s14, 1 }
   0xe   : > { %p111_p11 = scmp.lt.s32.totalorder %s576_s14, 3  ;;  %s123_s25 = sshll.u32 %s761_s1, 4  ;;  %s124_s25 = int_to_ptr.hbm [resolvable:$true] %s123_s25 }
   0xf   : > { %p344_p13 = scmp.ge.s32.totalorder %s576_s14, 2  ;;  %p388_p0 = scmp.lt.s32.totalorder %s576_s14, 2 }
  0x10   : > { %p664_p12 = pnand %p342_p10, %p111_p11  ;;  %s31_s28 = sadd.s32 1, %s572_s13 }
  0x11   : > { %p674_p2 = pnand %p388_p0, %p641_p5  ;;  %p33_p6 = scmp.ge.s32.totalorder %s31_s28, 2 }
  0x12   : > { %p375_p1 = pneg %p664_p12  ;;  %s134_s29 = sand.u32 1, %s564_s11  }
  0x13   : > { %s578_s30 = smov [#allocation6]   ;;  %s776_s28 = smov (%p33_p6, %s31_s28), 0 }
  0x14   : > { %p376_p4 = pnand %p375_p1, %p637_p3  ;;  %s345_s3 = sshll.u32 %s134_s29, 3 }
  0x15   : > { %s35_s4 = ssub.s32 %s572_s13, %s776_s28  ;;  %s365_s5 = sshll.u32 %s572_s13, 3 }
  0x16   : > { %378 = dma.hbm_to_smem (!%p376_p4), %s124_s25, 16, %s578_s30, [#allocation5]  }
  0x17   : > { %p38_p10 = scmp.eq.s32.totalorder %s35_s4, 0  ;;  %s144_s8 = scalar_lea.hbm %s760_s0, %s365_s5 }
  0x18   : > { %s138_s15 = scalar_lea.vmem [#allocation2], %s345_s3  ;;  %s145_s23 = sshll.u32 %s144_s8, 4  ;;  %s146_s23 = int_to_ptr.hbm [resolvable:$true] %s145_s23 }
  0x19   : > { %s147_s16 = sshll.u32 %s138_s15, 4  ;;  %s135_s24 = scalar_lea.sflag [#allocation3], %s134_s29  ;;  %s148_s16 = int_to_ptr.vmem [resolvable:$true] %s147_s16 }
  0x1a   : > { %s693_s19 = scalar_select %p38_p10, %s564_s11, %s40_s17  }
  0x1b   : > { %s579_s25 = smov 32   ;;  %s580_s30 = smov 2  }
  0x1c   : > { %382 = dma.hbm_to_vmem [thread:$0]  (!%p674_p2), %s146_s23, 128, %s148_s16, %s135_s24, %s579_s25, %s579_s25, %s580_s30  }
  0x1d   : > { %159 = sbr.rel (%p664_p12) target bundleno = 63 (0x3f), region = 28  ;;  %s700_s4 = sand.u32 (!%p664_p12), 1, %s560_s10  }
  0x1e   : > { %s349_s3 = sshll.u32 (!%p664_p12), %s700_s4, 3  ;;  %s162_s17 = scalar_lea.sflag (!%p664_p12), [#allocation3], %s700_s4 }
  0x1f   : > { %s165_s5 = scalar_lea.vmem (!%p664_p12), [#allocation2], %s349_s3 }
  0x22   : > { %543 = dma.done.wait (%p647_p7), %s162_s17, 128  }
  0x23   : > { %545 = vsyncadd (%p647_p7), %s162_s17, 4294967168 }
  0x24   : > { %547 = dma.done.wait (%p637_p3), [#allocation5], 16  }
  0x25   : > { %549 = vsyncadd (%p637_p3), [#allocation5], 4294967280 }
  0x26   : > { %176 = sfence }
  0x27   : > { %s351_s26 = sshll.u32 %s700_s4, 2  ;;  %v581_v0 = vmov 0.0   ;;  %s206_s29 = sld [smem:[#allocation6]]  ;;  %v199_v1 = vld [vmem:[%s165_s5] sm:$0x3] }
  0x28   : > { %s713_s27 = scalar_lea.vmem [#allocation7], %s351_s26  ;;  %s355_s20 = sld [smem:[#allocation6 + $0x1]]  ;;  %v352_v2 = vld [vmem:[%s165_s5 + $0x2] sm:$0x3]  ;;  %v353_v3 = vld [vmem:[%s165_s5 + $0x4] sm:$0x3] }
  0x29   : > { %197 = vst [vmem:[%s713_s27] sm:$0x3] %v581_v0  ;;  %s356_s6 = sld [smem:[#allocation6 + $0x2]]  ;;  %v354_v5 = vld [vmem:[%s165_s5 + $0x6] sm:$0x3]  ;;  %s366_s18 = sshll.u32 %s568_s12, 2 }
  0x2a   : > { %198 = vst [vmem:[%s713_s27 + $0x2] sm:$0x3] %v581_v0  ;;  %s357_s7 = sld [smem:[#allocation6 + $0x3]]  ;;  %s241_s16 = scalar_lea.hbm %s762_s2, %s366_s18 }
  0x2b   : > { %s242_s23 = sshll.u32 %s713_s27, 4  ;;  %s244_s24 = sshll.u32 %s241_s16, 4  ;;  %s243_s23 = int_to_ptr.vmem [resolvable:$true] %s242_s23  ;;  %s245_s24 = int_to_ptr.hbm [resolvable:$true] %s244_s24 }
  0x2c   : > { %s230_s12 = scalar_lea.sflag [#allocation4], %s700_s4  ;;  %s504_s25 = sshra.s32 %s245_s24, 4  ;;  %s505_s25 = int_to_ptr.hbm [resolvable:$true] %s504_s25 }
  0x2d   : > { %v207_v4 = vstv %s206_s29  ;;  %s506_s30 = scalar_lea.hbm %s505_s25, 4  ;;  %s510_s5 = scalar_lea.hbm %s762_s2, 8 }
  0x2e   : > { %v208_v6 = vmul.f32 %v207_v4, %v199_v1  ;;  %v210_v7 = vstv %s355_s20  ;;  %p507_p3 = scmp.ne.s32.totalorder %s505_s25, %s506_s30  ;;  %p511_p11 = scmp.lt.s32.totalorder %s505_s25, %s762_s2 }
  0x2f   : > { %v211_v8 = vmul.f32 %v352_v2, %v210_v7  ;;  %v213_v9 = vstv %s356_s6  ;;  %p512_p12 = scmp.lt.s32.totalorder %s510_s5, %s506_s30 }
  0x30   : > { %v214_v10 = vmul.f32 %v353_v3, %v213_v9  ;;  %v217_v11 = vstv %s357_s7  ;;  %v222_v15 = vld [vmem:[%s713_s27] sm:$0x3]  ;;  %p508_p5 = pnand %p507_p3, %p651_p8 }
  0x31   : > { %v218_v12 = vmul.f32 %v354_v5, %v217_v11  ;;  %v358_v17 = vld [vmem:[%s713_s27 + $0x2] sm:$0x3]  ;;  %p513_p0 = por %p512_p12, %p511_p11 }
  0x32   : > { %v215_v13 = vadd.f32 %v214_v10, %v208_v6  ;;  %p509_p7 = pneg %p508_p5 }
  0x33   : > { %v219_v14 = vadd.f32 %v218_v12, %v211_v8 }
  0x34   : > { %p514_p1 = pnand %p513_p0, %p509_p7 }
  0x35   : > { %v220_v16 = vadd.f32 %v219_v14, %v215_v13 }
  0x37   : > { %v223_v18 = vadd.f32 %v222_v15, %v220_v16  ;;  %v221_v19 = vmul.f32 %v220_v16, %v220_v16 }
  0x39   : > { %224 = vst [vmem:[%s713_s27] sm:$0x3] %v223_v18  ;;  %v227_v20 = vadd.f32 %v358_v17, %v221_v19 }
  0x3b   : > { %359 = vst [vmem:[%s713_s27 + $0x2] sm:$0x3] %v227_v20 }
  0x3c   : > { %517 = shalt.err (!%p514_p1)
}
  0x3d   : > { %s582_s4 = smov 32   ;;  %s583_s27 = smov 2  }
  0x3e   : > { %373 = dma.vmem_to_hbm [thread:$0]  (%p651_p8), %s243_s23, 64, %s245_s24, %s230_s12, %s582_s4, %s582_s4, %s583_s27  }
  0x3f PF: > { %s259_s20 = sand.u32 1, %s556_s9   ;;  %p384_p2 = pnand %p344_p13, %p655_p9 }
  0x40   : > { %s260_s6 = scalar_lea.sflag [#allocation4], %s259_s20 }
  0x41   : > { %p385_p4 = pneg %p384_p2 }
  0x43   : > { %551 = dma.done.wait (%p385_p4), %s260_s6, 64  }
  0x44   : > { %553 = vsyncadd (%p385_p4), %s260_s6, 4294967232  ;;  %s19_s14 = sadd.s32 1, %s576_s14   ;;  %s770_s9 = smov %s560_s10 }
  0x45   : > { %p16_p6 = scmp.ge.s32.totalorder %s19_s14, 4   ;;  %s771_s10 = smov %s564_s11 }
  0x46   : > { %s772_s11 = smov %s693_s19  ;;  %s773_s12 = smov %s572_s13 }
  0x47   : > { %s774_s13 = smov %s776_s28  ;;  %18 = sbr.rel (!%p16_p6) target bundleno = 7 (0x7), region = 86 }
  0x4c   :  { %266 = vsyncpa [#allocation3], 1 }
  0x4d   :  { %268 = vsyncpa [#allocation3 + $0x1], 1 }
  0x4e   :  { %269 = vsyncpa [#allocation4], 1 }
  0x4f   :  { %271 = vsyncpa [#allocation4 + $0x1], 1 }
  0x50   :  { %272 = vsyncpa [#allocation5], 1 }
  0x51   :  { %274 = vsyncpa [#allocation5 + $0x1], 1 }

</bundles_post_ra>
